<compile_context>
chip_gen: v6e
topology: v6e:2x2x1
jax: 0.10.0
libtpu: 0.0.40
codegen_flags: <defaults>
</compile_context>

<pallas_src>
import jax
import jax.numpy as jnp
import numpy as np
from jax.experimental import pallas as pl
from jax.experimental.pallas import tpu as pltpu


def _blended_linear_kernel(cw_ref, x_ref, w_ref, brow_ref, expand_ref, fold_ref, o_ref):
    """One batch tile per grid step — all reductions on the MXU.

    cw_ref     : [tb, E]        expert gate weights
    x_ref      : [tb, in]       inputs
    w_ref      : [in, E*out]    pre-transposed expert weights (lane-dense N dim)
    brow_ref   : [1,  E*out]    expert biases, flattened to match w_ref columns
    expand_ref : [E,  E*out]    0/1 matrix broadcasting gate e over its `out` lanes
    fold_ref   : [E*out, out]   0/1 matrix summing expert groups back to `out` lanes
    o_ref      : [tb, out]      output
    """
    f32 = jnp.float32

    # Single fused matmul over ALL experts + per-expert bias (sublane broadcast-add):
    #   y[b, e*out + o] = (x @ W_e^T)[b, o] + bias[e, o]
    y = jnp.dot(x_ref[...].astype(f32), w_ref[...].astype(f32),
                preferred_element_type=f32)                       # [tb, E*out]
    y = y + brow_ref[...].astype(f32)

    # Broadcast each gate across its expert's output block via a tiny MXU matmul
    # (avoids E sub-128 lane slices / lane broadcasts on the VPU/XLU).
    cw_big = jnp.dot(cw_ref[...].astype(f32), expand_ref[...],
                     preferred_element_type=f32)                  # [tb, E*out]

    # Weighted sum over experts as a matmul against a 0/1 folding matrix.
    out = jnp.dot(cw_big * y, fold_ref[...],
                  preferred_element_type=f32)                     # [tb, out]
    o_ref[...] = out.astype(o_ref.dtype)


def blended_linear(x, controlweights, weight, bias=None, *, block_b=None):
    """
    x              : [B, in_features]
    controlweights : [B, num_experts]
    weight         : [E, out_features, in_features]
    bias           : [E, out_features] or None
    returns        : [B, out_features]
    """
    B, in_features = x.shape
    E, out_features, in_w = weight.shape
    assert in_w == in_features
    assert controlweights.shape == (B, E)

    EO = E * out_features

    # One-time HBM relayouts (wrapper side, not per-kernel-step work):
    #   W_all[i, e*out + o] = weight[e, o, i]
    w_all = jnp.transpose(weight, (2, 0, 1)).reshape(in_features, EO)
    if bias is None:
        bias_row = jnp.zeros((1, EO), dtype=jnp.float32)
    else:
        assert bias.shape == (E, out_features)
        bias_row = bias.reshape(1, EO).astype(jnp.float32)
    # Expand[e, e'*out + o] = 1 iff e == e'
    expand = jnp.repeat(jnp.eye(E, dtype=jnp.float32), out_features, axis=1)   # [E, E*out]
    # Fold[e*out + o, o'] = 1 iff o == o'
    fold = jnp.tile(jnp.eye(out_features, dtype=jnp.float32), (E, 1))          # [E*out, out]

    # Batch tiling: one "parallel" grid axis. Small B -> a single tile.
    if block_b is None:
        block_b = B if B <= 256 else 256
    if block_b != B:
        assert block_b % 8 == 0 and B % block_b == 0, (
            "block_b must be a multiple of 8 dividing B (or equal to B)")
    grid = (pl.cdiv(B, block_b),)

    return pl.pallas_call(
        _blended_linear_kernel,
        out_shape=jax.ShapeDtypeStruct((B, out_features), x.dtype),
        grid_spec=pltpu.PrefetchScalarGridSpec(
            num_scalar_prefetch=0,
            grid=grid,
            in_specs=[
                pl.BlockSpec((block_b, E), lambda i: (i, 0)),            # controlweights
                pl.BlockSpec((block_b, in_features), lambda i: (i, 0)),  # x tile
                pl.BlockSpec((in_features, EO), lambda i: (0, 0)),       # fused weights
                pl.BlockSpec((1, EO), lambda i: (0, 0)),                 # bias row
                pl.BlockSpec((E, EO), lambda i: (0, 0)),                 # gate expander
                pl.BlockSpec((EO, out_features), lambda i: (0, 0)),      # expert folder
            ],
            out_specs=pl.BlockSpec((block_b, out_features), lambda i: (i, 0)),
        ),
        compiler_params=pltpu.CompilerParams(
            dimension_semantics=("parallel",),  # independent batch tiles
        ),
    )(controlweights, x, w_all, bias_row, expand, fold)


def _reference(x, controlweights, weight, bias):
    E, out_f, in_f = weight.shape
    W = controlweights @ weight.reshape(E, -1)            # [B, out*in]
    b = controlweights @ bias                             # [B, out]
    W = W.reshape(-1, out_f, in_f)                        # [B, out, in]
    m = jnp.einsum("boi,bi->bo", W, x)
    return m + b


if __name__ == "__main__":
    # Small shapes consistent with the module.
    B = 8
    in_features = 32
    out_features = 32
    num_experts = 4

    key = jax.random.PRNGKey(0)
    k_x, k_c, k_w, k_b = jax.random.split(key, 4)

    # Deterministic init mirroring kaiming_uniform_(a=sqrt(5)) on [E, out, in].
    fan_in = out_features * in_features
    w_bound = float(np.sqrt(1.0 / fan_in))
    b_bound = float(1.0 / np.sqrt(fan_in))
    weight = jax.random.uniform(
        k_w, (num_experts, out_features, in_features),
        minval=-w_bound, maxval=w_bound, dtype=jnp.float32)
    bias = jax.random.uniform(
        k_b, (num_experts, out_features),
        minval=-b_bound, maxval=b_bound, dtype=jnp.float32)

    x = jax.random.normal(k_x, (B, in_features), dtype=jnp.float32)
    logits = jax.random.normal(k_c, (B, num_experts), dtype=jnp.float32)
    controlweights = jax.nn.softmax(logits, axis=-1)  # typical expert gating weights

    out = blended_linear(x, controlweights, weight, bias)
    out = jax.block_until_ready(out)

    ref = _reference(x, controlweights, weight, bias)
    np.testing.assert_allclose(np.asarray(out), np.asarray(ref), rtol=1e-4, atol=1e-5)

    print("KERNEL_OK")
</pallas_src>

<mosaic_0001>
module attributes {stable_mosaic.version = 11 : i64} {
  func.func @_blended_linear_kernel(%arg0: i32, %arg1: memref<8x4xf32, #tpu.memory_space<vmem>>, %arg2: memref<8x32xf32, #tpu.memory_space<vmem>>, %arg3: memref<32x128xf32, #tpu.memory_space<vmem>>, %arg4: memref<1x128xf32, #tpu.memory_space<vmem>>, %arg5: memref<4x128xf32, #tpu.memory_space<vmem>>, %arg6: memref<128x32xf32, #tpu.memory_space<vmem>>, %arg7: memref<8x32xf32, #tpu.memory_space<vmem>>) attributes {dimension_semantics = [#tpu.dimension_semantics<parallel>], iteration_bounds = array<i64: 1>, scalar_prefetch = 0 : i64, scratch_operands = 0 : i64, tpu.core_type = #tpu.core_type<tc>, window_params = [{transform_indices = @transform_0, window_bounds = array<i64: 8, 4>}, {transform_indices = @transform_1, window_bounds = array<i64: 8, 32>}, {pipeline_mode = #tpu.pipeline_mode<synchronous>, transform_indices = @transform_2, window_bounds = array<i64: 32, 128>}, {pipeline_mode = #tpu.pipeline_mode<synchronous>, transform_indices = @transform_3, window_bounds = array<i64: 1, 128>}, {pipeline_mode = #tpu.pipeline_mode<synchronous>, transform_indices = @transform_4, window_bounds = array<i64: 4, 128>}, {pipeline_mode = #tpu.pipeline_mode<synchronous>, transform_indices = @transform_5, window_bounds = array<i64: 128, 32>}, {transform_indices = @transform_6, window_bounds = array<i64: 8, 32>}]} {
    %c0 = arith.constant 0 : index
    %c0_0 = arith.constant 0 : index
    %0 = vector.load %arg2[%c0, %c0_0] : memref<8x32xf32, #tpu.memory_space<vmem>>, vector<8x32xf32>
    %c0_1 = arith.constant 0 : index
    %c0_2 = arith.constant 0 : index
    %1 = vector.load %arg3[%c0_1, %c0_2] : memref<32x128xf32, #tpu.memory_space<vmem>>, vector<32x128xf32>
    %cst = arith.constant dense<0.000000e+00> : vector<8x128xf32>
    %2 = tpu.matmul %0, %1, %cst {dimension_numbers = #tpu.dot_dimension_numbers<[1], [0], [0], [1], [0, 0, 1, 1], [], []>} : vector<8x32xf32>, vector<32x128xf32>, vector<8x128xf32> -> vector<8x128xf32>
    %c0_3 = arith.constant 0 : index
    %c0_4 = arith.constant 0 : index
    %3 = vector.load %arg4[%c0_3, %c0_4] : memref<1x128xf32, #tpu.memory_space<vmem>>, vector<1x128xf32>
    %4 = vector.broadcast %3 : vector<1x128xf32> to vector<8x128xf32>
    %5 = arith.addf %2, %4 : vector<8x128xf32>
    %c0_5 = arith.constant 0 : index
    %c0_6 = arith.constant 0 : index
    %6 = vector.load %arg1[%c0_5, %c0_6] : memref<8x4xf32, #tpu.memory_space<vmem>>, vector<8x4xf32>
    %c0_7 = arith.constant 0 : index
    %c0_8 = arith.constant 0 : index
    %7 = vector.load %arg5[%c0_7, %c0_8] : memref<4x128xf32, #tpu.memory_space<vmem>>, vector<4x128xf32>
    %cst_9 = arith.constant dense<0.000000e+00> : vector<8x128xf32>
    %8 = tpu.matmul %6, %7, %cst_9 {dimension_numbers = #tpu.dot_dimension_numbers<[1], [0], [0], [1], [0, 0, 1, 1], [], []>} : vector<8x4xf32>, vector<4x128xf32>, vector<8x128xf32> -> vector<8x128xf32>
    %9 = arith.mulf %8, %5 : vector<8x128xf32>
    %c0_10 = arith.constant 0 : index
    %c0_11 = arith.constant 0 : index
    %10 = vector.load %arg6[%c0_10, %c0_11] : memref<128x32xf32, #tpu.memory_space<vmem>>, vector<128x32xf32>
    %cst_12 = arith.constant dense<0.000000e+00> : vector<8x32xf32>
    %11 = tpu.matmul %9, %10, %cst_12 {dimension_numbers = #tpu.dot_dimension_numbers<[1], [0], [0], [1], [0, 0, 1, 1], [], []>} : vector<8x128xf32>, vector<128x32xf32>, vector<8x32xf32> -> vector<8x32xf32>
    %c0_13 = arith.constant 0 : index
    %c0_14 = arith.constant 0 : index
    %12 = vector.load %arg7[%c0_13, %c0_14] : memref<8x32xf32, #tpu.memory_space<vmem>>, vector<8x32xf32>
    tpu.vector_store %arg7[%c0_13, %c0_14], %11 {strides = array<i32>} : memref<8x32xf32, #tpu.memory_space<vmem>>, vector<8x32xf32>,
    return
  }
  func.func @transform_0(%arg0: i32) -> (i32, i32) {
    %c0_i32 = arith.constant 0 : i32
    %c0_i32_0 = arith.constant 0 : i32
    return %arg0, %c0_i32 : i32, i32
  }
  func.func @transform_1(%arg0: i32) -> (i32, i32) {
    %c0_i32 = arith.constant 0 : i32
    %c0_i32_0 = arith.constant 0 : i32
    return %arg0, %c0_i32 : i32, i32
  }
  func.func @transform_2(%arg0: i32) -> (i32, i32) {
    %c0_i32 = arith.constant 0 : i32
    %c0_i32_0 = arith.constant 0 : i32
    %c0_i32_1 = arith.constant 0 : i32
    return %c0_i32, %c0_i32_0 : i32, i32
  }
  func.func @transform_3(%arg0: i32) -> (i32, i32) {
    %c0_i32 = arith.constant 0 : i32
    %c0_i32_0 = arith.constant 0 : i32
    %c0_i32_1 = arith.constant 0 : i32
    return %c0_i32, %c0_i32_0 : i32, i32
  }
  func.func @transform_4(%arg0: i32) -> (i32, i32) {
    %c0_i32 = arith.constant 0 : i32
    %c0_i32_0 = arith.constant 0 : i32
    %c0_i32_1 = arith.constant 0 : i32
    return %c0_i32, %c0_i32_0 : i32, i32
  }
  func.func @transform_5(%arg0: i32) -> (i32, i32) {
    %c0_i32 = arith.constant 0 : i32
    %c0_i32_0 = arith.constant 0 : i32
    %c0_i32_1 = arith.constant 0 : i32
    return %c0_i32, %c0_i32_0 : i32, i32
  }
  func.func @transform_6(%arg0: i32) -> (i32, i32) {
    %c0_i32 = arith.constant 0 : i32
    %c0_i32_0 = arith.constant 0 : i32
    return %arg0, %c0_i32 : i32, i32
  }
}

</mosaic_0001>

<bundles_post_ra>
// kernel: tpu_custom_call.1
= control target key start
LH: loop header
LB: loop body
LE: loop exit
PB: predicated region body
PF: predicated region fallthrough
CT: control target
= control target key end

     0   :  { %v396_v1 = vmov 0.0   ;;  %vm397_vm0 = vmmov 0   ;;  %vm36_vm1 = vcmask 261120   ;;  %s538_s0 = inlined_call_operand.vmem [shape: f32[8,4], index: 0, kind: input, shape index: {}]   ;;  %s539_s1 = inlined_call_operand.vmem [shape: f32[8,32], index: 1, kind: input, shape index: {}]   ;;  %s540_s2 = inlined_call_operand.vmem [shape: f32[32,128], index: 2, kind: input, shape index: {}]   ;;  %s541_s3 = inlined_call_operand.vmem [shape: f32[1,128], index: 3, kind: input, shape index: {}]   ;;  %s542_s4 = inlined_call_operand.vmem [shape: f32[4,128], index: 4, kind: input, shape index: {}]   ;;  %s543_s5 = inlined_call_operand.vmem [shape: f32[128,32], index: 5, kind: input, shape index: {}]   ;;  %s544_s6 = inlined_call_operand.hbm [shape: f32[8,32], index: 6, kind: output, shape index: {}]  }
   0x1   :  { %v28_v0 = vld [vmem:[%s540_s2 + $0x18] sm:$0xff]  ;;  %320 = vmatprep.subr.mxu0 %v396_v1  ;;  %v27_v2 = vld [vmem:[%s540_s2 + $0x10] sm:$0xff]  ;;  %328 = vmatprep.mubr.msk.f32.mxu0 %vm397_vm0, %v396_v1  ;;  %v26_v5 = vld [vmem:[%s540_s2 + $0x8] sm:$0xff] }
   0x2   :  { %321 = vmatpush3.msra.mxu0 %v28_v0  ;;  %336 = vmatprep.subr.mxu1 %v396_v1  ;;  %v206_v3 = vld [vmem:[%s543_s5 + $0x78] sm:$0xff]  ;;  %v205_v4 = vld [vmem:[%s543_s5 + $0x70] sm:$0xff]  ;;  %v204_v6 = vld [vmem:[%s543_s5 + $0x68] sm:$0xff] }
   0x3   :  { %322 = vmatprep.subr.mxu0 %v396_v1  ;;  %337 = vmatpush3.msra.mxu1 %v206_v3  ;;  %v25_v7 = vld [vmem:[%s540_s2] sm:$0xff] }
   0x4   :  { %323 = vmatpush3.msra.mxu0 %v27_v2  ;;  %338 = vmatprep.subr.mxu1 %v396_v1  ;;  %v24_v8 = vld [vmem:[%s539_s1] sm:$0xff] }
   0x5   :  { %324 = vmatprep.subr.mxu0 %v396_v1  ;;  %339 = vmatpush3.msra.mxu1 %v205_v4 }
   0x6   :  { %325 = vmatpush3.msra.mxu0 %v26_v5  ;;  %340 = vmatprep.subr.mxu1 %v396_v1 }
   0x7   :  { %11 = vsyncpa [#allocation3], 0  ;;  %326 = vmatprep.subr.mxu0 %v396_v1  ;;  %v111_v9 = vld [vmem:[%s542_s4] sm:$0xf]  ;;  %vm116_vm2 = vcmask 1043456   ;;  %341 = vmatpush3.msra.mxu1 %v204_v6  ;;  %vm112_vm3 = vcmask 31744  }
   0x8   :  { %327 = vmatpush3.msra.mxu0 %v25_v7  ;;  %342 = vmatprep.subr.mxu1 %v396_v1  ;;  %v203_v10 = vld [vmem:[%s543_s5 + $0x60] sm:$0xff]  ;;  %v202_v12 = vld [vmem:[%s543_s5 + $0x58] sm:$0xff]  ;;  %v201_v13 = vld [vmem:[%s543_s5 + $0x50] sm:$0xff]  ;;  %s398_s1 = smov [#allocation2]  }
   0x9   :  { %329 = vmatmul.mubr.msk.f32.vlgmr.msra.gmra.mxu0 %vm36_vm1, %v24_v8  ;;  %331 = vmatprep.subr.mxu0 %v396_v1  ;;  %v110_v11 = vld [vmem:[%s538_s0] sm:$0xff]  ;;  %v200_v14 = vld [vmem:[%s543_s5 + $0x48] sm:$0xff]  ;;  %v198_v16 = vld [vmem:[%s543_s5 + $0x38] sm:$0xff]  ;;  %s284_s16 = sshll.u32 %s398_s1, 4  ;;  %s285_s16 = int_to_ptr.vmem [resolvable:$true] %s284_s16 }
   0xa   :  { %332 = vmatpush3.msk.msra.mxu0 %vm116_vm2, %v111_v9  ;;  %333 = vmatprep.mubr.msk.f32.mxu0 %vm397_vm0, %v396_v1  ;;  %v199_v15 = vld [vmem:[%s543_s5 + $0x40] sm:$0xff]  ;;  %v197_v17 = vld [vmem:[%s543_s5 + $0x30] sm:$0xff]  ;;  %v196_v18 = vld [vmem:[%s543_s5 + $0x28] sm:$0xff]  ;;  %p379_p1 = scmp.lt.s32.totalorder %s285_s16, %s285_s16 }
   0xb   :  { %343 = vmatpush3.msra.mxu1 %v203_v10  ;;  %368 = vmatprep.mubr.msk.f32.mxu1 %vm397_vm0, %v396_v1  ;;  %v195_v19 = vld [vmem:[%s543_s5 + $0x20] sm:$0xff]  ;;  %v194_v20 = vld [vmem:[%s543_s5 + $0x18] sm:$0xff]  ;;  %v193_v21 = vld [vmem:[%s543_s5 + $0x10] sm:$0xff] }
   0xc   :  { %344 = vmatprep.subr.mxu1 %v396_v1  ;;  %v192_v22 = vld [vmem:[%s543_s5 + $0x8] sm:$0xff]  ;;  %v191_v23 = vld [vmem:[%s543_s5] sm:$0xff]  ;;  %s374_s5 = scalar_lea.vmem %s285_s16, 128 }
   0xd   :  { %334 = vmatmul.mubr.msk.f32.vlgmr.msra.gmra.mxu0 %vm112_vm3, %v110_v11  ;;  %345 = vmatpush3.msra.mxu1 %v202_v12  ;;  %v292_v24 = vld [vmem:[%s541_s3] ss:$0 sm:$0xff]  ;;  %p375_p0 = scmp.ne.s32.totalorder %s285_s16, %s374_s5  ;;  %p380_p2 = scmp.lt.s32.totalorder %s374_s5, %s374_s5 }
   0xe   :  { %346 = vmatprep.subr.mxu1 %v396_v1 }
   0xf   :  { %347 = vmatpush3.msra.mxu1 %v201_v13  ;;  %p381_p3 = por %p380_p2, %p379_p1 }
  0x10   :  { %348 = vmatprep.subr.mxu1 %v396_v1 }
  0x11   :  { %349 = vmatpush3.msra.mxu1 %v200_v14  ;;  %p382_p4 = pnand %p381_p3, %p375_p0 }
  0x12   :  { %350 = vmatprep.subr.mxu1 %v396_v1 }
  0x13   :  { %351 = vmatpush3.msra.mxu1 %v199_v15 }
  0x14   :  { %352 = vmatprep.subr.mxu1 %v396_v1 }
  0x15   :  { %353 = vmatpush3.msra.mxu1 %v198_v16 }
  0x16   :  { %354 = vmatprep.subr.mxu1 %v396_v1 }
  0x17   :  { %355 = vmatpush3.msra.mxu1 %v197_v17 }
  0x18   :  { %356 = vmatprep.subr.mxu1 %v396_v1 }
  0x19   :  { %357 = vmatpush3.msra.mxu1 %v196_v18 }
  0x1a   :  { %358 = vmatprep.subr.mxu1 %v396_v1 }
  0x1b   :  { %359 = vmatpush3.msra.mxu1 %v195_v19 }
  0x1c   :  { %360 = vmatprep.subr.mxu1 %v396_v1 }
  0x1d   :  { %361 = vmatpush3.msra.mxu1 %v194_v20 }
  0x1e   :  { %362 = vmatprep.subr.mxu1 %v396_v1 }
  0x1f   :  { %363 = vmatpush3.msra.mxu1 %v193_v21 }
  0x20   :  { %364 = vmatprep.subr.mxu1 %v396_v1 }
  0x21   :  { %365 = vmatpush3.msra.mxu1 %v192_v22 }
  0x22   :  { %366 = vmatprep.subr.mxu1 %v396_v1 }
  0x23   :  { %367 = vmatpush3.msra.mxu1 %v191_v23 }
  0xc9   :  { %v106_v25 = vpop.f32.mrf.mxu0 }
  0xca   :  { %v107_v27 = vadd.f32 %v292_v24, %v106_v25 }
  0xcb   :  { %v330_v26 = vpop.f32.mrf.mxu0 }
  0xcd   :  { %v186_v28 = vpop.f32.mrf.mxu0 }
  0xce   :  { %v190_v29 = vmul.f32 %v186_v28, %v107_v27 }
  0xcf   :  { %v335_v30 = vpop.f32.mrf.mxu0 }
  0xd0   :  { %369 = vmatmul.mubr.f32.vlgmr.msra.gmra.mxu1 %v190_v29 }
 0x190   :  { %v273_v31 = vpop.f32.mrf.mxu1 }
 0x191   :  { %277 = vst.msk [vmem:[#allocation2] sm:$0xff] %vm36_vm1, %v273_v31 }
 0x192   :  { %v370_v32 = vpop.f32.mrf.mxu1 }
 0x193   :  { %385 = shalt.err (!%p382_p4)
}
 0x194   :  { %287 = dma.vmem_to_hbm [thread:$0]  %s285_s16, 128, %s544_s6, [#allocation3]  }
 0x195   :  { %394 = dma.done.wait [#allocation3], 128  }
 0x196   :  { %395 = vsyncadd [#allocation3], 4294967168 }
 0x197   :  { %291 = vsyncpa [#allocation3], 1 }

</bundles_post_ra>
